<compile_context>
chip_gen: v7x
topology: tpu7x:2x2x1
jax: 0.10.0
libtpu: 0.0.40
codegen_flags: <defaults>
</compile_context>

<pallas_src>
import jax
import jax.numpy as jnp
from jax.experimental import pallas as pl
from jax.experimental.pallas import tpu as pltpu

_LANE = 128
_MIB = 1024 * 1024
# Conservative working-set budget: fits v7x's 64 MiB VMEM with headroom and is far
# under v5e/v6e's 128 MiB physical VMEM.
_VMEM_BUDGET = 40 * _MIB


def _round_up(x, m):
    return (x + m - 1) // m * m


def _per_row_bytes(input_dim, hidden_p, label_p):
    # VMEM bytes that scale with the batch tile:
    #   w1/w2 f32 tiles (double-buffered) + padded f32 logits tile (double-buffered)
    #   + f32 compose/hidden intermediates + bf16 casts of inputs and hidden.
    return (2 * 2 * 4 * input_dim
            + 2 * 4 * label_p
            + 4 * (input_dim + 2 * hidden_p)
            + 2 * (2 * input_dim + hidden_p))


def _choose_batch_tile(batch, per_row, weight_bytes, max_tile=512):
    # Weights use constant index_maps but are still pipelined -> count them twice.
    avail = max(_VMEM_BUDGET - 2 * weight_bytes, 0)
    tb = max(16, min(max_tile, (avail // max(per_row, 1)) // 16 * 16))
    # v7x has 2 TensorCores: a "parallel" batch axis only shards if it has >= 2
    # grid steps, so split mid-size batches in two (rounded to bf16 sublane packing).
    if batch < 2 * tb:
        tb = max(16, _round_up(-(-batch // 2), 16))
    return min(tb, max_tile)


# ----------------------------------------------------------------------------
# Kernels
# ----------------------------------------------------------------------------

def _classifier_kernel_fused(w1_ref, w2_ref,
                             w1cat_ref, w2cat_ref, mat_b_ref,
                             hid_wc_ref, hid_b_ref,
                             out_w_ref, out_b_ref,
                             o_ref):
    """First stage as two wide dots (requires input_dim % 128 == 0 so the lane
    split of the result is copy-free)."""
    D = mat_b_ref.shape[1]
    cdt = w1cat_ref.dtype

    w1 = w1_ref[...].astype(cdt)                    # in-kernel cast (inputs stay f32 in HBM)
    w2 = w2_ref[...].astype(cdt)

    # One wide MXU pass per input word: lanes [0:D] are the compose-layer
    # contribution, lanes [D:D+Hp] are the w1/w2 contribution to the hidden layer.
    s = (jnp.dot(w1, w1cat_ref[...], preferred_element_type=jnp.float32)
         + jnp.dot(w2, w2cat_ref[...], preferred_element_type=jnp.float32))

    # --- compose + F.normalize(p=2, dim=1, eps=1e-12) ------------------------
    composed = s[:, :D] + mat_b_ref[...]
    sumsq = jnp.sum(composed * composed, axis=1, keepdims=True)
    composed = composed * jax.lax.rsqrt(jnp.maximum(sumsq, jnp.float32(1e-24)))

    # --- hidden layer + ReLU --------------------------------------------------
    h = (s[:, D:]
         + jnp.dot(composed.astype(cdt), hid_wc_ref[...],
                   preferred_element_type=jnp.float32)
         + hid_b_ref[...])
    h = jnp.maximum(h, jnp.float32(0.0))

    # TODO(synk): dropout omitted (identity / p=0 semantics).

    # --- output layer (lane-dense padded label dim) ---------------------------
    o_ref[...] = (jnp.dot(h.astype(cdt), out_w_ref[...],
                          preferred_element_type=jnp.float32)
                  + out_b_ref[...])


def _classifier_kernel_split(w1_ref, w2_ref,
                             mat_w1_ref, mat_w2_ref, mat_b_ref,
                             hid_w1_ref, hid_w2_ref, hid_wc_ref, hid_b_ref,
                             out_w_ref, out_b_ref,
                             o_ref):
    """General path (any input_dim): weights pre-split in the wrapper so no
    sublane ref slicing happens inside the kernel."""
    cdt = mat_w1_ref.dtype

    w1 = w1_ref[...].astype(cdt)
    w2 = w2_ref[...].astype(cdt)

    composed = (jnp.dot(w1, mat_w1_ref[...], preferred_element_type=jnp.float32)
                + jnp.dot(w2, mat_w2_ref[...], preferred_element_type=jnp.float32)
                + mat_b_ref[...])
    sumsq = jnp.sum(composed * composed, axis=1, keepdims=True)
    composed = composed * jax.lax.rsqrt(jnp.maximum(sumsq, jnp.float32(1e-24)))

    h = (jnp.dot(w1, hid_w1_ref[...], preferred_element_type=jnp.float32)
         + jnp.dot(w2, hid_w2_ref[...], preferred_element_type=jnp.float32)
         + jnp.dot(composed.astype(cdt), hid_wc_ref[...],
                   preferred_element_type=jnp.float32)
         + hid_b_ref[...])
    h = jnp.maximum(h, jnp.float32(0.0))

    # TODO(synk): dropout omitted (identity / p=0 semantics).

    o_ref[...] = (jnp.dot(h.astype(cdt), out_w_ref[...],
                          preferred_element_type=jnp.float32)
                  + out_b_ref[...])


# ----------------------------------------------------------------------------
# One-time weight preparation (hoisted out of the per-call path)
# ----------------------------------------------------------------------------

def prepare_params(params, compute_dtype=jnp.bfloat16):
    """Pad / cast / split the weights once. The returned dict is reused across
    forward calls so the pallas_call is the only per-step work."""
    D = params["mat_w_T"].shape[1]
    H = params["hid_w_T"].shape[1]
    L = params["out_w_T"].shape[1]
    Hp = _round_up(H, _LANE)
    Lp = _round_up(L, _LANE)
    cdt = compute_dtype

    mat_w = params["mat_w_T"]                                          # (2D, D)
    hid_w = jnp.pad(params["hid_w_T"], ((0, 0), (0, Hp - H)))          # (3D, Hp)
    out_w = jnp.pad(params["out_w_T"],
                    ((0, Hp - H), (0, Lp - L))).astype(cdt)            # (Hp, Lp)
    mat_b = params["mat_b"].astype(jnp.float32)                        # (1, D)
    hid_b = jnp.pad(params["hid_b"], ((0, 0), (0, Hp - H))).astype(jnp.float32)
    out_b = jnp.pad(params["out_b"], ((0, 0), (0, Lp - L))).astype(jnp.float32)

    fused = (D % _LANE == 0)       # lane slice of the wide result is copy-free
    prep = {
        "input_dim": D, "hidden_dim": H, "label_nr": L,
        "hidden_p": Hp, "label_p": Lp, "fused": fused,
        "mat_b": mat_b, "hid_b": hid_b,
        "hid_wc": hid_w[2 * D:].astype(cdt),                           # (D, Hp)
        "out_w": out_w, "out_b": out_b,
    }
    if fused:
        # [compose | hidden] lane-concatenated per input word -> 2 wide MXU passes.
        prep["w1cat"] = jnp.concatenate([mat_w[:D], hid_w[:D]], axis=1).astype(cdt)
        prep["w2cat"] = jnp.concatenate([mat_w[D:], hid_w[D:2 * D]], axis=1).astype(cdt)
    else:
        # Pre-split so the kernel never sublane-slices a weight ref.
        prep["mat_w1"] = mat_w[:D].astype(cdt)
        prep["mat_w2"] = mat_w[D:].astype(cdt)
        prep["hid_w1"] = hid_w[:D].astype(cdt)
        prep["hid_w2"] = hid_w[D:2 * D].astype(cdt)
    return prep


# ----------------------------------------------------------------------------
# Forward
# ----------------------------------------------------------------------------

def matrix_twoword_classifier(w1, w2, prep, *, max_batch_tile=512):
    """Fused forward pass. Batch is tiled across a 1-D 'parallel' grid with a
    ragged (masked) last block; weights stay VMEM-resident via constant
    index_maps; hidden/label dims are zero-padded to 128 lanes and the logits
    are sliced back to the true label count."""
    batch, D = w1.shape
    assert D == prep["input_dim"]
    Hp, Lp = prep["hidden_p"], prep["label_p"]

    if prep["fused"]:
        kernel = _classifier_kernel_fused
        weights = (prep["w1cat"], prep["w2cat"], prep["mat_b"],
                   prep["hid_wc"], prep["hid_b"], prep["out_w"], prep["out_b"])
    else:
        kernel = _classifier_kernel_split
        weights = (prep["mat_w1"], prep["mat_w2"], prep["mat_b"],
                   prep["hid_w1"], prep["hid_w2"], prep["hid_wc"], prep["hid_b"],
                   prep["out_w"], prep["out_b"])

    weight_bytes = sum(int(w.size) * w.dtype.itemsize for w in weights)
    per_row = _per_row_bytes(D, Hp, Lp)
    tb = _choose_batch_tile(batch, per_row, weight_bytes, max_batch_tile)
    grid = (pl.cdiv(batch, tb),)

    # Explicit VMEM limit so realistic sizes don't trip the default scoped limit
    # (16 MiB on v5e, 32 MiB on v6e/v7x); kept well under v7x's 64 MiB physical.
    est = 2 * weight_bytes + tb * per_row
    vmem_limit = int(min(max(32 * _MIB, est + 8 * _MIB), 60 * _MIB))

    row_spec = pl.BlockSpec((tb, D), lambda i: (i, 0))

    def full(a):
        return pl.BlockSpec(a.shape, lambda i: (0, 0))

    out_p = pl.pallas_call(
        kernel,
        out_shape=jax.ShapeDtypeStruct((batch, Lp), jnp.float32),
        grid=grid,
        in_specs=[row_spec, row_spec] + [full(w) for w in weights],
        out_specs=pl.BlockSpec((tb, Lp), lambda i: (i, 0)),
        compiler_params=pltpu.CompilerParams(
            dimension_semantics=("parallel",),
            vmem_limit_bytes=vmem_limit),
    )(w1, w2, *weights)

    return out_p[:, :prep["label_nr"]]


# ----------------------------------------------------------------------------
# Parameter init + plain-JAX reference (same bf16-matmul / f32-accumulate recipe)
# ----------------------------------------------------------------------------

def init_params(key, input_dim, hidden_dim, label_nr, add_single_words=True):
    forward_dim = input_dim * 3 if add_single_words else input_dim
    ks = jax.random.split(key, 6)
    scale = 0.05
    return {
        # stored pre-transposed: (in_features, out_features)
        "mat_w_T": scale * jax.random.normal(ks[0], (2 * input_dim, input_dim), jnp.float32),
        "mat_b":   scale * jax.random.normal(ks[1], (1, input_dim), jnp.float32),
        "hid_w_T": scale * jax.random.normal(ks[2], (forward_dim, hidden_dim), jnp.float32),
        "hid_b":   scale * jax.random.normal(ks[3], (1, hidden_dim), jnp.float32),
        "out_w_T": scale * jax.random.normal(ks[4], (hidden_dim, label_nr), jnp.float32),
        "out_b":   scale * jax.random.normal(ks[5], (1, label_nr), jnp.float32),
    }


def reference_forward(w1, w2, params, compute_dtype=jnp.bfloat16):
    D = w1.shape[1]
    w1c = w1.astype(compute_dtype)
    w2c = w2.astype(compute_dtype)
    mw = params["mat_w_T"].astype(compute_dtype)
    hw = params["hid_w_T"].astype(compute_dtype)
    ow = params["out_w_T"].astype(compute_dtype)

    composed = (jnp.dot(w1c, mw[:D], preferred_element_type=jnp.float32)
                + jnp.dot(w2c, mw[D:], preferred_element_type=jnp.float32)
                + params["mat_b"])
    sumsq = jnp.sum(composed * composed, axis=1, keepdims=True)
    composed = composed * jax.lax.rsqrt(jnp.maximum(sumsq, 1e-24))
    cc = composed.astype(compute_dtype)

    h = (jnp.dot(w1c, hw[:D], preferred_element_type=jnp.float32)
         + jnp.dot(w2c, hw[D:2 * D], preferred_element_type=jnp.float32)
         + jnp.dot(cc, hw[2 * D:], preferred_element_type=jnp.float32)
         + params["hid_b"])
    h = jnp.maximum(h, 0.0)
    return (jnp.dot(h.astype(compute_dtype), ow, preferred_element_type=jnp.float32)
            + params["out_b"])


if __name__ == "__main__":
    key = jax.random.PRNGKey(0)

    configs = [
        # (batch, input_dim, hidden_dim, label_nr)
        (8, 32, 32, 8),      # exercises the split-weight path (D not lane-aligned)
        (48, 128, 64, 5),    # exercises the fused (lane-concat) path, a ragged last
                             # batch block and a 2-step parallel grid
    ]

    for cfg_i, (batch, input_dim, hidden_dim, label_nr) in enumerate(configs):
        key, k_w1, k_w2, k_p = jax.random.split(key, 4)
        w1 = jax.random.normal(k_w1, (batch, input_dim), jnp.float32)
        w2 = jax.random.normal(k_w2, (batch, input_dim), jnp.float32)
        params = init_params(k_p, input_dim, hidden_dim, label_nr,
                             add_single_words=True)

        prep = prepare_params(params)              # one-time weight prep (hoisted)
        logits = matrix_twoword_classifier(w1, w2, prep)
        jax.block_until_ready(logits)

        ref = reference_forward(w1, w2, params)
        assert logits.shape == (batch, label_nr)
        assert jnp.allclose(logits, ref, atol=2e-3, rtol=2e-3), \
            f"mismatch vs reference (config {cfg_i})"

    print("KERNEL_OK")
</pallas_src>

<mosaic_0001>
module attributes {stable_mosaic.version = 11 : i64} {
  func.func @_classifier_kernel_split(%arg0: i32, %arg1: memref<16x32xf32, #tpu.memory_space<vmem>>, %arg2: memref<16x32xf32, #tpu.memory_space<vmem>>, %arg3: memref<32x32xbf16, #tpu.memory_space<vmem>>, %arg4: memref<32x32xbf16, #tpu.memory_space<vmem>>, %arg5: memref<1x32xf32, #tpu.memory_space<vmem>>, %arg6: memref<32x128xbf16, #tpu.memory_space<vmem>>, %arg7: memref<32x128xbf16, #tpu.memory_space<vmem>>, %arg8: memref<32x128xbf16, #tpu.memory_space<vmem>>, %arg9: memref<1x128xf32, #tpu.memory_space<vmem>>, %arg10: memref<128x128xbf16, #tpu.memory_space<vmem>>, %arg11: memref<1x128xf32, #tpu.memory_space<vmem>>, %arg12: memref<16x128xf32, #tpu.memory_space<vmem>>) attributes {dimension_semantics = [#tpu.dimension_semantics<parallel>], iteration_bounds = array<i64: 1>, scalar_prefetch = 0 : i64, scratch_operands = 0 : i64, tpu.core_type = #tpu.core_type<tc>, window_params = [{transform_indices = @transform_0, window_bounds = array<i64: 16, 32>}, {transform_indices = @transform_1, window_bounds = array<i64: 16, 32>}, {pipeline_mode = #tpu.pipeline_mode<synchronous>, transform_indices = @transform_2, window_bounds = array<i64: 32, 32>}, {pipeline_mode = #tpu.pipeline_mode<synchronous>, transform_indices = @transform_3, window_bounds = array<i64: 32, 32>}, {pipeline_mode = #tpu.pipeline_mode<synchronous>, transform_indices = @transform_4, window_bounds = array<i64: 1, 32>}, {pipeline_mode = #tpu.pipeline_mode<synchronous>, transform_indices = @transform_5, window_bounds = array<i64: 32, 128>}, {pipeline_mode = #tpu.pipeline_mode<synchronous>, transform_indices = @transform_6, window_bounds = array<i64: 32, 128>}, {pipeline_mode = #tpu.pipeline_mode<synchronous>, transform_indices = @transform_7, window_bounds = array<i64: 32, 128>}, {pipeline_mode = #tpu.pipeline_mode<synchronous>, transform_indices = @transform_8, window_bounds = array<i64: 1, 128>}, {pipeline_mode = #tpu.pipeline_mode<synchronous>, transform_indices = @transform_9, window_bounds = array<i64: 128, 128>}, {pipeline_mode = #tpu.pipeline_mode<synchronous>, transform_indices = @transform_10, window_bounds = array<i64: 1, 128>}, {transform_indices = @transform_11, window_bounds = array<i64: 16, 128>}]} {
    %c0 = arith.constant 0 : index
    %c0_0 = arith.constant 0 : index
    %0 = vector.load %arg1[%c0, %c0_0] : memref<16x32xf32, #tpu.memory_space<vmem>>, vector<16x32xf32>
    %1 = arith.truncf %0 : vector<16x32xf32> to vector<16x32xbf16>
    %c0_1 = arith.constant 0 : index
    %c0_2 = arith.constant 0 : index
    %2 = vector.load %arg2[%c0_1, %c0_2] : memref<16x32xf32, #tpu.memory_space<vmem>>, vector<16x32xf32>
    %3 = arith.truncf %2 : vector<16x32xf32> to vector<16x32xbf16>
    %c0_3 = arith.constant 0 : index
    %c0_4 = arith.constant 0 : index
    %4 = vector.load %arg3[%c0_3, %c0_4] : memref<32x32xbf16, #tpu.memory_space<vmem>>, vector<32x32xbf16>
    %cst = arith.constant dense<0.000000e+00> : vector<16x32xf32>
    %5 = tpu.matmul %1, %4, %cst {dimension_numbers = #tpu.dot_dimension_numbers<[1], [0], [0], [1], [0, 0, 1, 1], [], []>} : vector<16x32xbf16>, vector<32x32xbf16>, vector<16x32xf32> -> vector<16x32xf32>
    %c0_5 = arith.constant 0 : index
    %c0_6 = arith.constant 0 : index
    %6 = vector.load %arg4[%c0_5, %c0_6] : memref<32x32xbf16, #tpu.memory_space<vmem>>, vector<32x32xbf16>
    %cst_7 = arith.constant dense<0.000000e+00> : vector<16x32xf32>
    %7 = tpu.matmul %3, %6, %cst_7 {dimension_numbers = #tpu.dot_dimension_numbers<[1], [0], [0], [1], [0, 0, 1, 1], [], []>} : vector<16x32xbf16>, vector<32x32xbf16>, vector<16x32xf32> -> vector<16x32xf32>
    %8 = arith.addf %5, %7 : vector<16x32xf32>
    %c0_8 = arith.constant 0 : index
    %c0_9 = arith.constant 0 : index
    %9 = vector.load %arg5[%c0_8, %c0_9] : memref<1x32xf32, #tpu.memory_space<vmem>>, vector<1x32xf32>
    %10 = vector.broadcast %9 : vector<1x32xf32> to vector<16x32xf32>
    %11 = arith.addf %8, %10 : vector<16x32xf32>
    %12 = arith.mulf %11, %11 : vector<16x32xf32>
    %cst_10 = arith.constant dense<0.000000e+00> : vector<16xf32>
    %13 = vector.multi_reduction <add>, %12, %cst_10 [1] : vector<16x32xf32> to vector<16xf32>
    %14 = vector.shape_cast %13 : vector<16xf32> to vector<16x1xf32>
    %cst_11 = arith.constant 1.000000e-24 : f32
    %15 = vector.broadcast %cst_11 : f32 to vector<16x1xf32>
    %16 = arith.maximumf %14, %15 : vector<16x1xf32>
    %17 = math.rsqrt %16 : vector<16x1xf32>
    %18 = vector.broadcast %17 : vector<16x1xf32> to vector<16x32xf32>
    %19 = arith.mulf %11, %18 : vector<16x32xf32>
    %c0_12 = arith.constant 0 : index
    %c0_13 = arith.constant 0 : index
    %20 = vector.load %arg6[%c0_12, %c0_13] : memref<32x128xbf16, #tpu.memory_space<vmem>>, vector<32x128xbf16>
    %cst_14 = arith.constant dense<0.000000e+00> : vector<16x128xf32>
    %21 = tpu.matmul %1, %20, %cst_14 {dimension_numbers = #tpu.dot_dimension_numbers<[1], [0], [0], [1], [0, 0, 1, 1], [], []>} : vector<16x32xbf16>, vector<32x128xbf16>, vector<16x128xf32> -> vector<16x128xf32>
    %c0_15 = arith.constant 0 : index
    %c0_16 = arith.constant 0 : index
    %22 = vector.load %arg7[%c0_15, %c0_16] : memref<32x128xbf16, #tpu.memory_space<vmem>>, vector<32x128xbf16>
    %cst_17 = arith.constant dense<0.000000e+00> : vector<16x128xf32>
    %23 = tpu.matmul %3, %22, %cst_17 {dimension_numbers = #tpu.dot_dimension_numbers<[1], [0], [0], [1], [0, 0, 1, 1], [], []>} : vector<16x32xbf16>, vector<32x128xbf16>, vector<16x128xf32> -> vector<16x128xf32>
    %24 = arith.addf %21, %23 : vector<16x128xf32>
    %25 = arith.truncf %19 : vector<16x32xf32> to vector<16x32xbf16>
    %c0_18 = arith.constant 0 : index
    %c0_19 = arith.constant 0 : index
    %26 = vector.load %arg8[%c0_18, %c0_19] : memref<32x128xbf16, #tpu.memory_space<vmem>>, vector<32x128xbf16>
    %cst_20 = arith.constant dense<0.000000e+00> : vector<16x128xf32>
    %27 = tpu.matmul %25, %26, %cst_20 {dimension_numbers = #tpu.dot_dimension_numbers<[1], [0], [0], [1], [0, 0, 1, 1], [], []>} : vector<16x32xbf16>, vector<32x128xbf16>, vector<16x128xf32> -> vector<16x128xf32>
    %28 = arith.addf %24, %27 : vector<16x128xf32>
    %c0_21 = arith.constant 0 : index
    %c0_22 = arith.constant 0 : index
    %29 = vector.load %arg9[%c0_21, %c0_22] : memref<1x128xf32, #tpu.memory_space<vmem>>, vector<1x128xf32>
    %30 = vector.broadcast %29 : vector<1x128xf32> to vector<16x128xf32>
    %31 = arith.addf %28, %30 : vector<16x128xf32>
    %cst_23 = arith.constant 0.000000e+00 : f32
    %32 = vector.broadcast %cst_23 : f32 to vector<16x128xf32>
    %33 = arith.maximumf %31, %32 : vector<16x128xf32>
    %34 = arith.truncf %33 : vector<16x128xf32> to vector<16x128xbf16>
    %c0_24 = arith.constant 0 : index
    %c0_25 = arith.constant 0 : index
    %35 = vector.load %arg10[%c0_24, %c0_25] : memref<128x128xbf16, #tpu.memory_space<vmem>>, vector<128x128xbf16>
    %cst_26 = arith.constant dense<0.000000e+00> : vector<16x128xf32>
    %36 = tpu.matmul %34, %35, %cst_26 {dimension_numbers = #tpu.dot_dimension_numbers<[1], [0], [0], [1], [0, 0, 1, 1], [], []>} : vector<16x128xbf16>, vector<128x128xbf16>, vector<16x128xf32> -> vector<16x128xf32>
    %c0_27 = arith.constant 0 : index
    %c0_28 = arith.constant 0 : index
    %37 = vector.load %arg11[%c0_27, %c0_28] : memref<1x128xf32, #tpu.memory_space<vmem>>, vector<1x128xf32>
    %38 = vector.broadcast %37 : vector<1x128xf32> to vector<16x128xf32>
    %39 = arith.addf %36, %38 : vector<16x128xf32>
    %c0_29 = arith.constant 0 : index
    %c0_30 = arith.constant 0 : index
    %40 = vector.load %arg12[%c0_29, %c0_30] : memref<16x128xf32, #tpu.memory_space<vmem>>, vector<16x128xf32>
    tpu.vector_store %arg12[%c0_29, %c0_30], %39 {strides = array<i32>} : memref<16x128xf32, #tpu.memory_space<vmem>>, vector<16x128xf32>,
    return
  }
  func.func @transform_0(%arg0: i32) -> (i32, i32) {
    %c0_i32 = arith.constant 0 : i32
    %c0_i32_0 = arith.constant 0 : i32
    return %arg0, %c0_i32 : i32, i32
  }
  func.func @transform_1(%arg0: i32) -> (i32, i32) {
    %c0_i32 = arith.constant 0 : i32
    %c0_i32_0 = arith.constant 0 : i32
    return %arg0, %c0_i32 : i32, i32
  }
  func.func @transform_2(%arg0: i32) -> (i32, i32) {
    %c0_i32 = arith.constant 0 : i32
    %c0_i32_0 = arith.constant 0 : i32
    %c0_i32_1 = arith.constant 0 : i32
    return %c0_i32, %c0_i32_0 : i32, i32
  }
  func.func @transform_3(%arg0: i32) -> (i32, i32) {
    %c0_i32 = arith.constant 0 : i32
    %c0_i32_0 = arith.constant 0 : i32
    %c0_i32_1 = arith.constant 0 : i32
    return %c0_i32, %c0_i32_0 : i32, i32
  }
  func.func @transform_4(%arg0: i32) -> (i32, i32) {
    %c0_i32 = arith.constant 0 : i32
    %c0_i32_0 = arith.constant 0 : i32
    %c0_i32_1 = arith.constant 0 : i32
    return %c0_i32, %c0_i32_0 : i32, i32
  }
  func.func @transform_5(%arg0: i32) -> (i32, i32) {
    %c0_i32 = arith.constant 0 : i32
    %c0_i32_0 = arith.constant 0 : i32
    %c0_i32_1 = arith.constant 0 : i32
    return %c0_i32, %c0_i32_0 : i32, i32
  }
  func.func @transform_6(%arg0: i32) -> (i32, i32) {
    %c0_i32 = arith.constant 0 : i32
    %c0_i32_0 = arith.constant 0 : i32
    %c0_i32_1 = arith.constant 0 : i32
    return %c0_i32, %c0_i32_0 : i32, i32
  }
  func.func @transform_7(%arg0: i32) -> (i32, i32) {
    %c0_i32 = arith.constant 0 : i32
    %c0_i32_0 = arith.constant 0 : i32
    %c0_i32_1 = arith.constant 0 : i32
    return %c0_i32, %c0_i32_0 : i32, i32
  }
  func.func @transform_8(%arg0: i32) -> (i32, i32) {
    %c0_i32 = arith.constant 0 : i32
    %c0_i32_0 = arith.constant 0 : i32
    %c0_i32_1 = arith.constant 0 : i32
    return %c0_i32, %c0_i32_0 : i32, i32
  }
  func.func @transform_9(%arg0: i32) -> (i32, i32) {
    %c0_i32 = arith.constant 0 : i32
    %c0_i32_0 = arith.constant 0 : i32
    %c0_i32_1 = arith.constant 0 : i32
    return %c0_i32, %c0_i32_0 : i32, i32
  }
  func.func @transform_10(%arg0: i32) -> (i32, i32) {
    %c0_i32 = arith.constant 0 : i32
    %c0_i32_0 = arith.constant 0 : i32
    %c0_i32_1 = arith.constant 0 : i32
    return %c0_i32, %c0_i32_0 : i32, i32
  }
  func.func @transform_11(%arg0: i32) -> (i32, i32) {
    %c0_i32 = arith.constant 0 : i32
    %c0_i32_0 = arith.constant 0 : i32
    return %arg0, %c0_i32 : i32, i32
  }
}

</mosaic_0001>

<bundles_post_ra>
// kernel: tpu_custom_call.1
= control target key start
LH: loop header
LB: loop body
LE: loop exit
PB: predicated region body
PF: predicated region fallthrough
CT: control target
= control target key end

     0   :  { %16 = vsyncpa [#allocation3], 0  ;;  %s1186_s0 = inlined_call_operand.hbm [shape: f32[8,32], index: 0, kind: input, shape index: {}]   ;;  %s1187_s1 = inlined_call_operand.hbm [shape: f32[8,32], index: 1, kind: input, shape index: {}]   ;;  %s1188_s2 = inlined_call_operand.hbm [shape: bf16[32,32], index: 2, kind: input, shape index: {}]   ;;  %s1189_s3 = inlined_call_operand.hbm [shape: bf16[32,32], index: 3, kind: input, shape index: {}]   ;;  %s1190_s4 = inlined_call_operand.vmem [shape: f32[1,32], index: 4, kind: input, shape index: {}]   ;;  %s1191_s5 = inlined_call_operand.vmem [shape: bf16[32,128], index: 5, kind: input, shape index: {}]   ;;  %s1192_s6 = inlined_call_operand.hbm [shape: bf16[32,128], index: 6, kind: input, shape index: {}]   ;;  %s1193_s7 = inlined_call_operand.hbm [shape: bf16[32,128], index: 7, kind: input, shape index: {}]   ;;  %s1194_s8 = inlined_call_operand.vmem [shape: f32[1,128], index: 8, kind: input, shape index: {}]   ;;  %s1195_s9 = inlined_call_operand.hbm [shape: bf16[128,128], index: 9, kind: input, shape index: {}]   ;;  %s1196_s10 = inlined_call_operand.vmem [shape: f32[1,128], index: 10, kind: input, shape index: {}]   ;;  %s1197_s11 = inlined_call_operand.hbm [shape: f32[8,128], index: 11, kind: output, shape index: {}]  }
   0x1   :  { %17 = vsyncpa [#allocation6], 0 }
   0x2   :  { %18 = vsyncpa [#allocation9], 0 }
   0x3   :  { %19 = vsyncpa [#allocation12], 0 }
   0x4   :  { %20 = vsyncpa [#allocation4], 0 }
   0x5   :  { %25 = vsyncadd [#allocation3], 128  ;;  %s940_s17 = smov [#allocation2]   ;;  %s754_s21 = scalar_lea.hbm %s1186_s0, 128 }
   0x6   :  { %s26_s18 = sshll.u32 %s940_s17, 4  ;;  %p755_p0 = scmp.ne.s32.totalorder %s1186_s0, %s754_s21  ;;  %s27_s18 = int_to_ptr.vmem [resolvable:$true] %s26_s18 }
   0x7   :  { %p758_p1 = scmp.lt.u32.totalorder %s754_s21, %s1186_s0 }
   0x9   :  { %p760_p2 = pnand %p758_p1, %p755_p0 }
   0xb   :  { %763 = shalt.err (!%p760_p2)
}
   0xc   :  { %s764_s26 = scalar_lea.vmem %s27_s18, 128  ;;  %s768_s27 = scalar_lea.vmem %s27_s18, 256 }
   0xd   :  { %p765_p3 = scmp.ne.s32.totalorder %s27_s18, %s764_s26  ;;  %p769_p4 = scmp.lt.s32.totalorder %s27_s18, %s27_s18 }
   0xe   :  { %p770_p5 = scmp.lt.s32.totalorder %s768_s27, %s764_s26 }
  0x10   :  { %p771_p6 = por %p770_p5, %p769_p4 }
  0x12   :  { %p772_p7 = pnand %p771_p6, %p765_p3 }
  0x14   :  { %775 = shalt.err (!%p772_p7)
}
  0x15   :  { %s941_s28 = smov 128   ;;  %s942_s29 = smov 8  }
  0x16   :  { %32 = dma.hbm_to_vmem [thread:$0]  %s1186_s0, 128, %s27_s18, [#allocation3], %s941_s28, %s941_s28, %s942_s29  }
  0x17   :  { %37 = vsyncadd [#allocation6], 128  ;;  %s943_s13 = smov [#allocation5]   ;;  %s776_s17 = scalar_lea.hbm %s1187_s1, 128 }
  0x18   :  { %s38_s14 = sshll.u32 %s943_s13, 4  ;;  %p777_p8 = scmp.ne.s32.totalorder %s1187_s1, %s776_s17  ;;  %s39_s14 = int_to_ptr.vmem [resolvable:$true] %s38_s14 }
  0x19   :  { %p780_p9 = scmp.lt.u32.totalorder %s776_s17, %s1187_s1 }
  0x1b   :  { %p782_p10 = pnand %p780_p9, %p777_p8 }
  0x1d   :  { %785 = shalt.err (!%p782_p10)
}
  0x1e   :  { %s786_s23 = scalar_lea.vmem %s39_s14, 128  ;;  %s790_s0 = scalar_lea.vmem %s39_s14, 256 }
  0x1f   :  { %p787_p11 = scmp.ne.s32.totalorder %s39_s14, %s786_s23  ;;  %p791_p12 = scmp.lt.s32.totalorder %s39_s14, %s39_s14 }
  0x20   :  { %p792_p13 = scmp.lt.s32.totalorder %s790_s0, %s786_s23 }
  0x22   :  { %p793_p0 = por %p792_p13, %p791_p12 }
  0x24   :  { %p794_p1 = pnand %p793_p0, %p787_p11 }
  0x26   :  { %797 = shalt.err (!%p794_p1)
}
  0x27   :  { %44 = dma.hbm_to_vmem [thread:$0]  %s1187_s1, 128, %s39_s14, [#allocation6], %s941_s28, %s941_s28, %s942_s29  }
  0x28   :  { %s944_s25 = smov [#allocation8]   ;;  %s945_s27 = smov [#allocation11]  }
  0x29   :  { %s62_s26 = sshll.u32 %s944_s25, 4  ;;  %s90_s30 = sshll.u32 %s945_s27, 4  ;;  %s63_s26 = int_to_ptr.vmem [resolvable:$true] %s62_s26  ;;  %s91_s30 = int_to_ptr.vmem [resolvable:$true] %s90_s30 }
  0x2a   :  { %s798_s15 = scalar_lea.hbm %s1189_s3, 256 }
  0x2b   :  { %p799_p2 = scmp.ne.s32.totalorder %s1189_s3, %s798_s15  ;;  %p802_p3 = scmp.lt.u32.totalorder %s798_s15, %s1189_s3 }
  0x2d   :  { %p804_p4 = pnand %p802_p3, %p799_p2 }
  0x2f   :  { %807 = shalt.err (!%p804_p4)
}
  0x30   :  { %s808_s1 = scalar_lea.vmem %s63_s26, 256  ;;  %p813_p6 = scmp.lt.s32.totalorder %s63_s26, %s63_s26 }
  0x31   :  { %p809_p5 = scmp.ne.s32.totalorder %s63_s26, %s808_s1  ;;  %p814_p7 = scmp.lt.s32.totalorder %s808_s1, %s808_s1 }
  0x33   :  { %p815_p8 = por %p814_p7, %p813_p6 }
  0x35   :  { %p816_p9 = pnand %p815_p8, %p809_p5 }
  0x37   :  { %819 = shalt.err (!%p816_p9)
}
  0x38   :  { %s946_s14 = smov 64   ;;  %s947_s21 = smov 4  }
  0x39   :  { %68 = dma.hbm_to_vmem [thread:$0]  %s1189_s3, 256, %s63_s26, [#allocation9], %s946_s14, %s946_s14, %s947_s21  }
  0x3a   :  { %s820_s24 = scalar_lea.hbm %s1193_s7, 256 }
  0x3b   :  { %p821_p10 = scmp.ne.s32.totalorder %s1193_s7, %s820_s24  ;;  %p824_p11 = scmp.lt.u32.totalorder %s820_s24, %s1193_s7 }
  0x3d   :  { %p826_p12 = pnand %p824_p11, %p821_p10 }
  0x3f   :  { %829 = shalt.err (!%p826_p12)
}
  0x40   :  { %s830_s15 = scalar_lea.vmem %s91_s30, 256  ;;  %p835_p0 = scmp.lt.s32.totalorder %s91_s30, %s91_s30 }
  0x41   :  { %p831_p13 = scmp.ne.s32.totalorder %s91_s30, %s830_s15  ;;  %p836_p1 = scmp.lt.s32.totalorder %s830_s15, %s830_s15 }
  0x43   :  { %p837_p2 = por %p836_p1, %p835_p0 }
  0x45   :  { %p838_p3 = pnand %p837_p2, %p831_p13 }
  0x47   :  { %841 = shalt.err (!%p838_p3)
}
  0x48   :  { %96 = dma.hbm_to_vmem [thread:$0]  %s1193_s7, 256, %s91_s30, [#allocation12], %s946_s14, %s946_s14, %s947_s21  }
  0x49   :  { %s948_s16 = smov [#allocation7]   ;;  %s949_s19 = smov [#allocation10]  }
  0x4a   :  { %s50_s17 = sshll.u32 %s948_s16, 4  ;;  %s78_s20 = sshll.u32 %s949_s19, 4  ;;  %s51_s17 = int_to_ptr.vmem [resolvable:$true] %s50_s17  ;;  %s79_s20 = int_to_ptr.vmem [resolvable:$true] %s78_s20 }
  0x4b   :  { %s842_s23 = scalar_lea.hbm %s1188_s2, 256 }
  0x4c   :  { %p843_p4 = scmp.ne.s32.totalorder %s1188_s2, %s842_s23  ;;  %p846_p5 = scmp.lt.u32.totalorder %s842_s23, %s1188_s2 }
  0x4e   :  { %p848_p6 = pnand %p846_p5, %p843_p4 }
  0x50   :  { %851 = shalt.err (!%p848_p6)
}
  0x51   :  { %s852_s7 = scalar_lea.vmem %s51_s17, 256  ;;  %p857_p8 = scmp.lt.s32.totalorder %s51_s17, %s51_s17 }
  0x52   :  { %p853_p7 = scmp.ne.s32.totalorder %s51_s17, %s852_s7  ;;  %p858_p9 = scmp.lt.s32.totalorder %s852_s7, %s852_s7 }
  0x54   :  { %p859_p10 = por %p858_p9, %p857_p8 }
  0x56   :  { %p860_p11 = pnand %p859_p10, %p853_p7 }
  0x58   :  { %863 = shalt.err (!%p860_p11)
}
  0x59   :  { %56 = dma.hbm_to_vmem [thread:$0]  %s1188_s2, 256, %s51_s17, [#allocation6], %s946_s14, %s946_s14, %s947_s21  }
  0x5a   :  { %s864_s15 = scalar_lea.hbm %s1192_s6, 256 }
  0x5b   :  { %p865_p12 = scmp.ne.s32.totalorder %s1192_s6, %s864_s15  ;;  %p868_p13 = scmp.lt.u32.totalorder %s864_s15, %s1192_s6 }
  0x5d   :  { %p870_p0 = pnand %p868_p13, %p865_p12 }
  0x5f   :  { %873 = shalt.err (!%p870_p0)
}
  0x60   :  { %s874_s1 = scalar_lea.vmem %s79_s20, 256  ;;  %p879_p2 = scmp.lt.s32.totalorder %s79_s20, %s79_s20 }
  0x61   :  { %p875_p1 = scmp.ne.s32.totalorder %s79_s20, %s874_s1  ;;  %p880_p3 = scmp.lt.s32.totalorder %s874_s1, %s874_s1 }
  0x63   :  { %p881_p4 = por %p880_p3, %p879_p2 }
  0x65   :  { %p882_p5 = pnand %p881_p4, %p875_p1 }
  0x67   :  { %885 = shalt.err (!%p882_p5)
}
  0x68   :  { %84 = dma.hbm_to_vmem [thread:$0]  %s1192_s6, 256, %s79_s20, [#allocation9], %s946_s14, %s946_s14, %s947_s21  }
  0x69   :  { %s950_s22 = smov [#allocation13]   ;;  %s886_s24 = scalar_lea.hbm %s1195_s9, 1024 }
  0x6a   :  { %s104_s23 = sshll.u32 %s950_s22, 4  ;;  %p887_p6 = scmp.ne.s32.totalorder %s1195_s9, %s886_s24  ;;  %s105_s23 = int_to_ptr.vmem [resolvable:$true] %s104_s23 }
  0x6b   :  { %p890_p7 = scmp.lt.u32.totalorder %s886_s24, %s1195_s9 }
  0x6d   :  { %p892_p8 = pnand %p890_p7, %p887_p6 }
  0x6f   :  { %895 = shalt.err (!%p892_p8)
}
  0x70   :  { %s896_s12 = scalar_lea.vmem %s105_s23, 1024  ;;  %p901_p10 = scmp.lt.s32.totalorder %s105_s23, %s105_s23 }
  0x71   :  { %p897_p9 = scmp.ne.s32.totalorder %s105_s23, %s896_s12  ;;  %p902_p11 = scmp.lt.s32.totalorder %s896_s12, %s896_s12 }
  0x73   :  { %p903_p12 = por %p902_p11, %p901_p10 }
  0x75   :  { %p904_p13 = pnand %p903_p12, %p897_p9 }
  0x77   :  { %907 = shalt.err (!%p904_p13)
}
  0x78   :  { %110 = dma.hbm_to_vmem [thread:$0]  %s1195_s9, 1024, %s105_s23, [#allocation12], %s946_s14, %s946_s14, %s947_s21  }
  0x79   :  { %930 = dma.done.wait [#allocation3], 256  }
  0x7a   :  { %931 = vsyncadd [#allocation3], 4294967040 }
  0x7b   :  { %932 = dma.done.wait [#allocation6], 512  }
  0x7c   :  { %933 = vsyncadd [#allocation6], 4294966784 }
  0x7d   :  { %934 = dma.done.wait [#allocation9], 512  }
  0x7e   :  { %935 = vsyncadd [#allocation9], 4294966784 }
  0x7f   :  { %936 = dma.done.wait [#allocation12], 1280  }
  0x80   :  { %937 = vsyncadd [#allocation12], 4294966016  ;;  %v951_v0 = vmov 0.0   ;;  %vm952_vm0 = vmmov 0   ;;  %v732_v1 = vld [vmem:[#allocation8] sm:$0xff]   ;;  %v733_v2 = vld [vmem:[#allocation8 + $0x8] sm:$0xff]  }
  0x81   :  { %658 = vmatprep.subr.bf16.mxu0 %v951_v0  ;;  %662 = vmatprep.mubr.msk.bf16.mxu0 %vm952_vm0, %v951_v0  ;;  %v138_v3 = vld [vmem:[#allocation5] sm:$0xff]  ;;  %v139_v4 = vld [vmem:[#allocation5 + $0x8] sm:$0xff]  ;;  %vm161_vm1 = vcmask 261120   ;;  %v734_v6 = vld [vmem:[#allocation7] sm:$0xff]  }
  0x82   :  { %682 = vmatprep.subr.bf16.mxu1 %v951_v0  ;;  %686 = vmatprep.mubr.msk.bf16.mxu1 %vm952_vm0, %v951_v0  ;;  %v140_v5 = vpack.c.bf16 %v139_v4, %v138_v3  ;;  %v735_v7 = vld [vmem:[#allocation7 + $0x8] sm:$0xff]   ;;  %v135_v8 = vld [vmem:[#allocation2] sm:$0xff]  ;;  %v614_v16 = vld [vmem:[%s1190_s4] ss:$0 sm:$0xff] }
  0x83   :  { %659 = vmatpush3.bf16.msra.mxu0 %v732_v1  ;;  %v136_v9 = vld [vmem:[#allocation2 + $0x8] sm:$0xff]  ;;  %v736_v28 = vld [vmem:[#allocation10] sm:$0xff]   ;;  %v737_v29 = vld [vmem:[%s1191_s5] sm:$0xff]  }
  0x84   :  { %660 = vmatprep.subr.bf16.mxu0 %v951_v0  ;;  %v137_v10 = vpack.c.bf16 %v136_v9, %v135_v8  ;;  %683 = vmatpush3.bf16.msra.mxu1 %v737_v29  ;;  %v738_v30 = vld [vmem:[#allocation10 + $0x8] sm:$0xff]   ;;  %v739_v31 = vld [vmem:[%s1191_s5 + $0x8] sm:$0xff]   ;;  %v740_v32 = vld [vmem:[#allocation11] sm:$0xff]  }
  0x85   :  { %684 = vmatprep.subr.bf16.mxu1 %v951_v0  ;;  %v741_v33 = vld [vmem:[#allocation11 + $0x8] sm:$0xff]   ;;  %v742_v34 = vld [vmem:[#allocation13] sm:$0xff]   ;;  %v743_v35 = vld [vmem:[#allocation13 + $0x8] sm:$0xff]  }
  0x86   :  { %v744_v36 = vld [vmem:[#allocation13 + $0x10] sm:$0xff]   ;;  %v745_v37 = vld [vmem:[#allocation13 + $0x18] sm:$0xff]   ;;  %v746_v38 = vld [vmem:[#allocation13 + $0x20] sm:$0xff]  }
  0x87   :  { %661 = vmatpush3.bf16.msra.mxu0 %v733_v2  ;;  %v747_v58 = vld [vmem:[#allocation13 + $0x28] sm:$0xff]   ;;  %v748_v59 = vld [vmem:[#allocation13 + $0x30] sm:$0xff]   ;;  %v749_v60 = vld [vmem:[#allocation13 + $0x38] sm:$0xff]  }
  0x88   :  { %666 = vmatprep.subr.bf16.mxu0 %v951_v0  ;;  %685 = vmatpush3.bf16.msra.mxu1 %v739_v31  ;;  %v624_v62 = vld [vmem:[%s1194_s8] ss:$0 sm:$0xff] }
  0x89   :  { %698 = vmatprep.subr.bf16.mxu1 %v951_v0 }
  0x8a   :  { %663 = vmatmul.mubr.msk.bf16.vlgmr.msra.gmra.mrb[0].mxu0 %vm161_vm1, %v140_v5 }
  0x8b   :  { %667 = vmatpush3.bf16.msra.mxu0 %v734_v6  ;;  %670 = vmatprep.mubr.msk.bf16.mxu0 %vm952_vm0, %v951_v0 }
  0x8c   :  { %668 = vmatprep.subr.bf16.mxu0 %v951_v0  ;;  %687 = vmatmul.mubr.msk.bf16.vlgmr.msra.gmra.mrb[0].mxu1 %vm161_vm1, %v137_v10 }
  0x8d   :  { %714 = vmatprep.mubr.msk.bf16.mxu1 %vm952_vm0, %v951_v0  ;;  %699 = vmatpush3.bf16.msra.mxu1 %v742_v34 }
  0x8e   :  { %700 = vmatprep.subr.bf16.mxu1 %v951_v0 }
  0x8f   :  { %669 = vmatpush3.bf16.msra.mxu0 %v735_v7 }
  0x90   :  { %674 = vmatprep.subr.bf16.mxu0 %v951_v0 }
  0x91   :  { %701 = vmatpush3.bf16.msra.mxu1 %v743_v35 }
  0x92   :  { %671 = vmatmul.mubr.msk.bf16.vlgmr.msra.gmra.mrb[4].mxu0 %vm161_vm1, %v137_v10  ;;  %702 = vmatprep.subr.bf16.mxu1 %v951_v0 }
  0x93   :  { %678 = vmatprep.mubr.msk.bf16.mxu0 %vm952_vm0, %v951_v0  ;;  %675 = vmatpush3.bf16.msra.mxu0 %v736_v28 }
  0x94   :  { %676 = vmatprep.subr.bf16.mxu0 %v951_v0 }
  0x95   :  { %703 = vmatpush3.bf16.msra.mxu1 %v744_v36 }
  0x96   :  { %704 = vmatprep.subr.bf16.mxu1 %v951_v0 }
  0x97   :  { %677 = vmatpush3.bf16.msra.mxu0 %v738_v30 }
  0x98   :  { %690 = vmatprep.subr.bf16.mxu0 %v951_v0 }
  0x99   :  { %705 = vmatpush3.bf16.msra.mxu1 %v745_v37 }
  0x9a   :  { %679 = vmatmul.mubr.msk.bf16.vlgmr.msra.gmra.mrb[8].mxu0 %vm161_vm1, %v140_v5  ;;  %706 = vmatprep.subr.bf16.mxu1 %v951_v0 }
  0x9b   :  { %694 = vmatprep.mubr.msk.bf16.mxu0 %vm952_vm0, %v951_v0  ;;  %691 = vmatpush3.bf16.msra.mxu0 %v740_v32 }
  0x9c   :  { %692 = vmatprep.subr.bf16.mxu0 %v951_v0 }
  0x9d   :  { %707 = vmatpush3.bf16.msra.mxu1 %v746_v38 }
  0x9e   :  { %708 = vmatprep.subr.bf16.mxu1 %v951_v0 }
  0x9f   :  { %693 = vmatpush3.bf16.msra.mxu0 %v741_v33 }
  0xa1   :  { %709 = vmatpush3.bf16.msra.mxu1 %v747_v58 }
  0xa2   :  { %710 = vmatprep.subr.bf16.mxu1 %v951_v0 }
  0xa5   :  { %711 = vmatpush3.bf16.msra.mxu1 %v748_v59 }
  0xa6   :  { %712 = vmatprep.subr.bf16.mxu1 %v951_v0  ;;  %v625_v0 = vld [vmem:[%s1196_s10] ss:$0 sm:$0xff] }
  0xa9   :  { %713 = vmatpush3.bf16.msra.mxu1 %v749_v60 }
 0x15d   :  { %v199_v11 = vpop.f32.mrb[0].mxu0 }
 0x15e   :  { %v664_v12 = vpop.f32.mrb[1].mxu0 }
 0x15f   :  { %v202_v13 = vpop.f32.mrb[2].mxu0  ;;  %v392_v50 = vpop.f32.mrb[0].mxu1 }
 0x160   :  { %v665_v14 = vpop.f32.mrb[3].mxu0  ;;  %v688_v53 = vpop.f32.mrb[1].mxu1 }
 0x161   :  { %v395_v55 = vpop.f32.mrb[2].mxu1 }
 0x162   :  { %v689_v57 = vpop.f32.mrb[3].mxu1 }
 0x165   :  { %v255_v15 = vpop.f32.mrb[4].mxu0 }
 0x166   :  { %v256_v17 = vadd.f32 %v255_v15, %v199_v11  ;;  %v672_v18 = vpop.f32.mrb[5].mxu0 }
 0x167   :  { %v258_v19 = vpop.f32.mrb[6].mxu0 }
 0x168   :  { %v269_v20 = vadd.f32 %v614_v16, %v256_v17  ;;  %v259_v21 = vadd.f32 %v258_v19, %v202_v13  ;;  %v673_v22 = vpop.f32.mrb[7].mxu0 }
 0x16a   :  { %v270_v23 = vadd.f32 %v614_v16, %v259_v21  ;;  %v271_v24 = vmul.f32 %v269_v20, %v269_v20 }
 0x16c   :  { %v273_v25 = vsel %vm161_vm1, %v271_v24, 0.0  ;;  %v272_v26 = vmul.f32 %v270_v23, %v270_v23 }
 0x16d   :  { %274 = vadd.xlane.f32.xlu0 %v273_v25  ;;  %v339_v48 = vpop.f32.mrb[8].mxu0 }
 0x16e   :  { %v276_v27 = vsel %vm161_vm1, %v272_v26, 0.0  ;;  %v680_v49 = vpop.f32.mrb[9].mxu0  ;;  %v393_v51 = vadd.f32 %v392_v50, %v339_v48 }
 0x16f   :  { %v342_v52 = vpop.f32.mrb[10].mxu0 }
 0x170   :  { %v681_v54 = vpop.f32.mrb[11].mxu0  ;;  %v396_v56 = vadd.f32 %v395_v55, %v342_v52 }
 0x171   :  { %277 = vadd.xlane.f32.xlu0 %v276_v27 }
 0x1fa   :  { %v275_v39 = vpop.xlane.xlu0 %274 }
 0x1fb   :  { %v279_v40 = vmax.f32 %v275_v39, 1e-24 }
 0x1fd   :  { %750 = vrsqrt.f32 %v279_v40 }
 0x1fe   :  { %v278_v41 = vpop.xlane.xlu0 %277 }
 0x1ff   :  { %v280_v42 = vmax.f32 %v278_v41, 1e-24 }
 0x201   :  { %752 = vrsqrt.f32 %v280_v42 }
 0x207   :  { %v751_v43 = vpop.eup %750 }
 0x208   :  { %v283_v45 = vmul.f32 %v751_v43, %v269_v20 }
 0x20b   :  { %v753_v44 = vpop.eup %752 }
 0x20c   :  { %v284_v46 = vmul.f32 %v753_v44, %v270_v23 }
 0x20e   :  { %v399_v47 = vpack.c.bf16 %v284_v46, %v283_v45 }
 0x210   :  { %695 = vmatmul.mubr.msk.bf16.vlgmr.msra.gmra.mrb[12].mxu0 %vm161_vm1, %v399_v47 }
 0x2e3   :  { %v453_v61 = vpop.f32.mrb[12].mxu0 }
 0x2e4   :  { %v460_v63 = vadd.f32 %v453_v61, %v393_v51  ;;  %v696_v1 = vpop.f32.mrb[13].mxu0 }
 0x2e5   :  { %v456_v2 = vpop.f32.mrb[14].mxu0 }
 0x2e6   :  { %v469_v3 = vadd.f32 %v624_v62, %v460_v63  ;;  %v461_v4 = vadd.f32 %v456_v2, %v396_v56  ;;  %v697_v5 = vpop.f32.mrb[15].mxu0 }
 0x2e8   :  { %v470_v6 = vadd.f32 %v624_v62, %v461_v4  ;;  %v471_v7 = vmax.f32 %v469_v3, 0.0 }
 0x2ea   :  { %v472_v8 = vmax.f32 %v470_v6, 0.0 }
 0x2ec   :  { %v473_v9 = vpack.c.bf16 %v472_v8, %v471_v7 }
 0x2ee   :  { %715 = vmatmul.mubr.bf16.vlgmr.msra.gmra.mrb[4].mxu1 %v473_v9 }
 0x3c1   :  { %v579_v10 = vpop.f32.mrb[4].mxu1 }
 0x3c2   :  { %v580_v11 = vadd.f32 %v625_v0, %v579_v10  ;;  %v716_v12 = vpop.f32.mrb[5].mxu1 }
 0x3c3   :  { %v582_v13 = vpop.f32.mrb[6].mxu1 }
 0x3c4   :  { %586 = vst [vmem:[#allocation14] sm:$0xff] %v580_v11  ;;  %v583_v14 = vadd.f32 %v625_v0, %v582_v13  ;;  %v717_v15 = vpop.f32.mrb[7].mxu1 }
 0x3c6   :  { %587 = vst [vmem:[#allocation14 + $0x8] sm:$0xff] %v583_v14 }
 0x3c7   :  { %592 = vsyncadd [#allocation4], 128  ;;  %s953_s8 = smov [#allocation14]  }
 0x3c8   :  { %s593_s19 = sshll.u32 %s953_s8, 4  ;;  %s594_s19 = int_to_ptr.vmem [resolvable:$true] %s593_s19 }
 0x3c9   :  { %s908_s1 = scalar_lea.vmem %s594_s19, 128  ;;  %s912_s2 = scalar_lea.vmem %s594_s19, 256 }
 0x3ca   :  { %p909_p0 = scmp.ne.s32.totalorder %s594_s19, %s908_s1  ;;  %p913_p1 = scmp.lt.s32.totalorder %s594_s19, %s594_s19 }
 0x3cb   :  { %p914_p2 = scmp.lt.s32.totalorder %s912_s2, %s908_s1 }
 0x3cd   :  { %p915_p3 = por %p914_p2, %p913_p1 }
 0x3cf   :  { %p916_p4 = pnand %p915_p3, %p909_p0 }
 0x3d1   :  { %919 = shalt.err (!%p916_p4)
}
 0x3d2   :  { %s920_s22 = scalar_lea.hbm %s1197_s11, 128 }
 0x3d3   :  { %p921_p5 = scmp.ne.s32.totalorder %s1197_s11, %s920_s22  ;;  %p924_p6 = scmp.lt.u32.totalorder %s920_s22, %s1197_s11 }
 0x3d5   :  { %p926_p7 = pnand %p924_p6, %p921_p5 }
 0x3d7   :  { %929 = shalt.err (!%p926_p7)
}
 0x3d8   :  { %599 = dma.vmem_to_hbm [thread:$0]  %s594_s19, 128, %s1197_s11, [#allocation4], %s941_s28, %s941_s28, %s942_s29  }
 0x3d9   :  { %938 = dma.done.wait [#allocation4], 256  }
 0x3da   :  { %939 = vsyncadd [#allocation4], 4294967040 }
 0x3db   :  { %603 = vsyncpa [#allocation3], 1 }
 0x3dc   :  { %604 = vsyncpa [#allocation6], 1 }
 0x3dd   :  { %605 = vsyncpa [#allocation9], 1 }
 0x3de   :  { %606 = vsyncpa [#allocation12], 1 }
 0x3df   :  { %607 = vsyncpa [#allocation4], 1 }

</bundles_post_ra>
